<compile_context>
chip_gen: v7x
topology: tpu7x:2x2x1
jax: 0.10.0
libtpu: 0.0.40
codegen_flags: <defaults>
</compile_context>

<pallas_src>
import math

import jax
import jax.numpy as jnp
from jax.experimental import pallas as pl
from jax.experimental.pallas import tpu as pltpu

MAX_LEN = 512
D_MODEL = 768


def make_pe():
    """Deterministic buffer identical to the torch __init__ (float32), shape (512, 768)."""
    position = jnp.arange(MAX_LEN, dtype=jnp.float32)[:, None]                 # (512, 1)
    div_term = jnp.exp(
        jnp.arange(0, D_MODEL, 2, dtype=jnp.float32) * (-math.log(10000.0) / D_MODEL)
    )                                                                          # (384,)
    angles = position * div_term                                               # (512, 384)
    pe = jnp.zeros((MAX_LEN, D_MODEL), dtype=jnp.float32)
    pe = pe.at[:, 0::2].set(jnp.sin(angles))
    pe = pe.at[:, 1::2].set(jnp.cos(angles))
    return pe


def _pos_enc_kernel(x_ref, pe_ref, o_ref):
    # x_ref/o_ref: (TB, S, D) batch tile (model dtype); pe_ref: (S, D) resident f32 window.
    # Add in f32 (matches the f32 torch buffer), cast on store. The cast rides idle
    # VPU slots in this DMA-bound kernel, so it is free.
    x = x_ref[...].astype(jnp.float32)
    o_ref[...] = (x + pe_ref[...][None, :, :]).astype(o_ref.dtype)


def _target_block_bytes():
    """Per-operand byte budget per grid step. ~6 MiB on v7x (3.2 TB/s HBM needs bigger
    blocks to amortize the ~0.35 us/step overhead), ~4 MiB elsewhere. Either way
    double-buffered x + out + pe stay under the explicit 32 MiB scoped-VMEM limit."""
    try:
        kind = jax.devices()[0].device_kind.lower()
    except Exception:
        kind = ""
    if "v7" in kind:
        return 6 * 1024 * 1024
    return 4 * 1024 * 1024


def _pick_tb(B, S, itemsize, target_bytes):
    """Dtype-aware batch tile: fill the byte budget, keep >=2 grid steps when B > 1
    (pipeline overlap + megacore sharding), and among tilings with the same step
    count prefer one that divides B evenly (no masked partial last block)."""
    row_bytes = S * D_MODEL * itemsize
    tb = max(1, min(B, target_bytes // row_bytes))
    if tb >= B and B > 1:
        tb = (B + 1) // 2  # force at least 2 grid steps
    min_steps = -(-B // tb)
    for cand in range(tb, 0, -1):
        if -(-B // cand) != min_steps:
            break
        if B % cand == 0:
            return cand
    return tb


def positional_encoding(x, pe):
    """x: (B, S, D) in any float dtype, pe: (MAX_LEN, D) float32.
    Returns x + pe[:S] broadcast over batch, in x.dtype."""
    B, S, D = x.shape
    assert D == D_MODEL, "d_model must match the pe buffer (768)"
    assert 0 < S <= MAX_LEN

    tb = _pick_tb(B, S, jnp.dtype(x.dtype).itemsize, _target_block_bytes())
    grid = (pl.cdiv(B, tb),)

    def build(single_buffer_pe):
        pe_kwargs = {}
        if single_buffer_pe and hasattr(pl, "Buffered"):
            # pe's block index is constant -> one DMA; a single buffer saves ~1.5 MiB VMEM.
            pe_kwargs = dict(pipeline_mode=pl.Buffered(1))
        return pl.pallas_call(
            _pos_enc_kernel,
            out_shape=jax.ShapeDtypeStruct((B, S, D), x.dtype),
            grid=grid,
            in_specs=[
                pl.BlockSpec((tb, S, D), lambda i: (i, 0, 0)),
                # Window the full (512, 768) f32 buffer directly (no wrapper slice/cast).
                pl.BlockSpec((S, D), lambda i: (0, 0), **pe_kwargs),
            ],
            out_specs=pl.BlockSpec((tb, S, D), lambda i: (i, 0, 0)),
            compiler_params=pltpu.CompilerParams(
                dimension_semantics=("parallel",),   # shards batch tiles across TCs on v7x
                vmem_limit_bytes=32 * 1024 * 1024,   # headroom on all gens (v5e default is 16 MiB)
            ),
        )

    try:
        return build(True)(x, pe)
    except Exception:
        # Fall back to default double-buffered pe if Buffered(1) is rejected by this runtime.
        return build(False)(x, pe)

# TODO(synk): in a full model this broadcast add should be fused into an adjacent
# kernel (embedding scale / dropout / layernorm) instead of paying its own HBM pass;
# that fusion is the only remaining 2x-class win for this memory-bound op.


if __name__ == "__main__":
    key = jax.random.PRNGKey(0)
    pe = make_pe()

    # Small shape consistent with the module's forward: batch=2, seq=8, d_model=768.
    B, S, D = 2, 8, D_MODEL
    x = jax.random.normal(key, (B, S, D), dtype=jnp.float32)
    out = jax.block_until_ready(positional_encoding(x, pe))

    # Pure-JAX reference mimicking the torch forward exactly (transpose/add/transpose).
    ref = jnp.transpose(jnp.transpose(x, (1, 0, 2)) + pe[:S, None, :], (1, 0, 2))
    assert out.shape == (B, S, D)
    assert jnp.allclose(out, ref, atol=1e-6), "mismatch vs reference (small shape)"

    # Second shape exercising multi-step tiling and a ragged (partial) last batch tile.
    B2, S2 = 3, 384
    x2 = jax.random.normal(jax.random.PRNGKey(0), (B2, S2, D_MODEL), dtype=jnp.float32)
    out2 = jax.block_until_ready(positional_encoding(x2, pe))
    ref2 = x2 + pe[None, :S2, :]
    assert jnp.allclose(out2, ref2, atol=1e-6), "mismatch vs reference (tiled shape)"

    # Third: bf16 input exercises the in-kernel f32 add + cast-on-store path.
    B3, S3 = 4, 128
    x3 = jax.random.normal(jax.random.PRNGKey(0), (B3, S3, D_MODEL), dtype=jnp.bfloat16)
    out3 = jax.block_until_ready(positional_encoding(x3, pe))
    ref3 = (x3.astype(jnp.float32) + pe[None, :S3, :]).astype(jnp.bfloat16)
    assert out3.dtype == jnp.bfloat16
    assert jnp.allclose(out3.astype(jnp.float32), ref3.astype(jnp.float32), atol=1e-2), \
        "mismatch vs reference (bf16 shape)"

    print("KERNEL_OK")
</pallas_src>

<mosaic_0001>
module attributes {stable_mosaic.version = 11 : i64} {
  func.func @_pos_enc_kernel(%arg0: i32, %arg1: memref<1x8x768xf32, #tpu.memory_space<vmem>>, %arg2: memref<8x768xf32, #tpu.memory_space<vmem>>, %arg3: memref<1x8x768xf32, #tpu.memory_space<vmem>>) attributes {dimension_semantics = [#tpu.dimension_semantics<parallel>], iteration_bounds = array<i64: 2>, scalar_prefetch = 0 : i64, scratch_operands = 0 : i64, tpu.core_type = #tpu.core_type<tc>, window_params = [{transform_indices = @transform_0, window_bounds = array<i64: 1, 8, 768>}, {pipeline_mode = #tpu.pipeline_mode<synchronous>, transform_indices = @transform_1, window_bounds = array<i64: 8, 768>}, {transform_indices = @transform_2, window_bounds = array<i64: 1, 8, 768>}]} {
    %c0 = arith.constant 0 : index
    %c0_0 = arith.constant 0 : index
    %c0_1 = arith.constant 0 : index
    %0 = vector.load %arg1[%c0, %c0_0, %c0_1] : memref<1x8x768xf32, #tpu.memory_space<vmem>>, vector<1x8x768xf32>
    %c0_2 = arith.constant 0 : index
    %c0_3 = arith.constant 0 : index
    %1 = vector.load %arg2[%c0_2, %c0_3] : memref<8x768xf32, #tpu.memory_space<vmem>>, vector<8x768xf32>
    %2 = vector.shape_cast %1 : vector<8x768xf32> to vector<1x8x768xf32>
    %3 = arith.addf %0, %2 : vector<1x8x768xf32>
    %c0_4 = arith.constant 0 : index
    %c0_5 = arith.constant 0 : index
    %c0_6 = arith.constant 0 : index
    %4 = vector.load %arg3[%c0_4, %c0_5, %c0_6] : memref<1x8x768xf32, #tpu.memory_space<vmem>>, vector<1x8x768xf32>
    tpu.vector_store %arg3[%c0_4, %c0_5, %c0_6], %3 {strides = array<i32>} : memref<1x8x768xf32, #tpu.memory_space<vmem>>, vector<1x8x768xf32>,
    return
  }
  func.func @transform_0(%arg0: i32) -> (i32, i32, i32) {
    %c0_i32 = arith.constant 0 : i32
    %c0_i32_0 = arith.constant 0 : i32
    %c0_i32_1 = arith.constant 0 : i32
    return %arg0, %c0_i32, %c0_i32_0 : i32, i32, i32
  }
  func.func @transform_1(%arg0: i32) -> (i32, i32) {
    %c0_i32 = arith.constant 0 : i32
    %c0_i32_0 = arith.constant 0 : i32
    %c0_i32_1 = arith.constant 0 : i32
    return %c0_i32, %c0_i32_0 : i32, i32
  }
  func.func @transform_2(%arg0: i32) -> (i32, i32, i32) {
    %c0_i32 = arith.constant 0 : i32
    %c0_i32_0 = arith.constant 0 : i32
    %c0_i32_1 = arith.constant 0 : i32
    return %arg0, %c0_i32, %c0_i32_0 : i32, i32, i32
  }
}

module attributes {stable_mosaic.version = 11 : i64} {
  func.func @_pos_enc_kernel(%arg0: i32, %arg1: memref<1x8x768xf32, #tpu.memory_space<vmem>>, %arg2: memref<8x768xf32, #tpu.memory_space<vmem>>, %arg3: memref<1x8x768xf32, #tpu.memory_space<vmem>>) attributes {dimension_semantics = [#tpu.dimension_semantics<parallel>], iteration_bounds = array<i64: 2>, scalar_prefetch = 0 : i64, scratch_operands = 0 : i64, tpu.core_type = #tpu.core_type<tc>, window_params = [{transform_indices = @transform_0, window_bounds = array<i64: 1, 8, 768>}, {transform_indices = @transform_1, window_bounds = array<i64: 8, 768>}, {transform_indices = @transform_2, window_bounds = array<i64: 1, 8, 768>}]} {
    %c0 = arith.constant 0 : index
    %c0_0 = arith.constant 0 : index
    %c0_1 = arith.constant 0 : index
    %0 = vector.load %arg1[%c0, %c0_0, %c0_1] : memref<1x8x768xf32, #tpu.memory_space<vmem>>, vector<1x8x768xf32>
    %c0_2 = arith.constant 0 : index
    %c0_3 = arith.constant 0 : index
    %1 = vector.load %arg2[%c0_2, %c0_3] : memref<8x768xf32, #tpu.memory_space<vmem>>, vector<8x768xf32>
    %2 = vector.shape_cast %1 : vector<8x768xf32> to vector<1x8x768xf32>
    %3 = arith.addf %0, %2 : vector<1x8x768xf32>
    %c0_4 = arith.constant 0 : index
    %c0_5 = arith.constant 0 : index
    %c0_6 = arith.constant 0 : index
    %4 = vector.load %arg3[%c0_4, %c0_5, %c0_6] : memref<1x8x768xf32, #tpu.memory_space<vmem>>, vector<1x8x768xf32>
    tpu.vector_store %arg3[%c0_4, %c0_5, %c0_6], %3 {strides = array<i32>} : memref<1x8x768xf32, #tpu.memory_space<vmem>>, vector<1x8x768xf32>,
    return
  }
  func.func @transform_0(%arg0: i32) -> (i32, i32, i32) {
    %c0_i32 = arith.constant 0 : i32
    %c0_i32_0 = arith.constant 0 : i32
    %c0_i32_1 = arith.constant 0 : i32
    return %arg0, %c0_i32, %c0_i32_0 : i32, i32, i32
  }
  func.func @transform_1(%arg0: i32) -> (i32, i32) {
    %c0_i32 = arith.constant 0 : i32
    %c0_i32_0 = arith.constant 0 : i32
    %c0_i32_1 = arith.constant 0 : i32
    return %c0_i32, %c0_i32_0 : i32, i32
  }
  func.func @transform_2(%arg0: i32) -> (i32, i32, i32) {
    %c0_i32 = arith.constant 0 : i32
    %c0_i32_0 = arith.constant 0 : i32
    %c0_i32_1 = arith.constant 0 : i32
    return %arg0, %c0_i32, %c0_i32_0 : i32, i32, i32
  }
}

</mosaic_0001>

<bundles_post_ra>
// kernel: tpu_custom_call.1
= control target key start
LH: loop header
LB: loop body
LE: loop exit
PB: predicated region body
PF: predicated region fallthrough
CT: control target
= control target key end

     0   :  { %7 = vsyncpa [#allocation3], 0  ;;  %s722_s0 = inlined_call_operand.hbm [shape: f32[2,8,768], index: 0, kind: input, shape index: {}]   ;;  %s723_s1 = inlined_call_operand.hbm [shape: f32[512,768], index: 1, kind: input, shape index: {}]   ;;  %s724_s2 = inlined_call_operand.hbm [shape: f32[2,8,768], index: 2, kind: output, shape index: {}]  }
   0x1   :  { %9 = vsyncpa [#allocation3 + $0x1], 0 }
   0x2   :  { %10 = vsyncpa [#allocation6], 0 }
   0x3   :  { %11 = vsyncpa [#allocation4], 0 }
   0x4   :  { %13 = vsyncpa [#allocation4 + $0x1], 0  ;;  %s511_s9 = smov 0   ;;  %s513_s10 = smov 0  }
   0x5   :  { %s515_s11 = smov 0   ;;  %s517_s12 = smov 0  }
   0x6 LB: > { %s532_s13 = sadd.s32 4294967295, %s491_s12   ;;  %s292_s14 = sadd.s32 4294967294, %s491_s12   ;;  %s491_s12 = sphi %s517_s12, %s748_s12   ;;  %s487_s11 = sphi %s515_s11, %s747_s11   ;;  %s483_s10 = sphi %s513_s10, %s746_s10   ;;  %s479_s9 = sphi %s511_s9, %s745_s9  }
   0x7   : > { %p39_p0 = scmp.ne.s32.totalorder %s483_s10, %s479_s9  ;;  %p725_p1 = scmp.eq.s32.totalorder %s532_s13, 0 }
   0x8   : > { %p90_p3 = scmp.eq.s32.totalorder %s292_s14, 1  ;;  %p293_p5 = scmp.ge.s32.totalorder %s491_s12, 1 }
   0x9   : > { %p541_p4 = por %p725_p1, %p39_p0  ;;  %p97_p7 = scmp.lt.s32.totalorder %s491_s12, 3 }
   0xa   : > { %p546_p6 = por %p90_p3, %p39_p0  ;;  %s493_s18 = smov [#allocation5]  }
   0xb   : > { %s728_s15 = scalar_select %p541_p4, 1, 0 }
   0xc   : > { %s729_s16 = scalar_select %p546_p6, 1, 0 }
   0xd   : > { %p551_p8 = pnand %p293_p5, %p97_p7  ;;  %s110_s19 = sshll.u32 %s493_s18, 4  ;;  %s555_s19 = int_to_ptr.vmem [resolvable:$true] %s110_s19 }
   0xe   : > { %s561_s20 = sadd.s32 1, %s491_s12   ;;  %s26_s24 = sadd.s32 1, %s487_s11 }
   0xf   : > { %s730_s17 = scalar_select %p551_p8, 1, 0 }
  0x10   : > { %p314_p10 = pneg %p551_p8  ;;  %s23_s22 = ssub.s32 %s491_s12, %s561_s20 }
  0x11   : > { %p571_p12 = scmp.eq.s32.totalorder %s23_s22, 0  ;;  %s363_s27 = scalar_lea.hbm %s723_s1, 768 }
  0x12   : > { %p565_p11 = pnand %p314_p10, %p725_p1  ;;  %p364_p0 = scmp.ne.s32.totalorder %s723_s1, %s363_s27 }
  0x13   : > { %s732_s23 = scalar_select %p571_p12, 1, 0 }
  0x14   : > { %p365_p3 = pneg %p565_p11  ;;  %s368_s4 = scalar_lea.hbm %s723_s1, 49152 }
  0x15   : > { %p369_p10 = scmp.lt.u32.totalorder %s368_s4, %s363_s27  ;;  %p370_p9 = scmp.lt.u32.totalorder %s363_s27, %s723_s1 }
  0x16   : > { %p366_p5 = pnand %p365_p3, %p364_p0 }
  0x17   : > { %p371_p1 = por %p370_p9, %p369_p10 }
  0x18   : > { %p367_p7 = pneg %p366_p5 }
  0x1a   : > { %p372_p2 = pnand %p371_p1, %p367_p7 }
  0x1c   : > { %375 = shalt.err (!%p372_p2)
}
  0x1d   : > { %s376_s7 = scalar_lea.vmem %s555_s19, 768  ;;  %p384_p5 = scmp.lt.s32.totalorder %s555_s19, %s555_s19 }
  0x1e   : > { %p377_p13 = scmp.ne.s32.totalorder %s555_s19, %s376_s7  ;;  %p385_p4 = scmp.lt.s32.totalorder %s376_s7, %s376_s7 }
  0x20   : > { %p379_p6 = pnand %p377_p13, %p365_p3  ;;  %p386_p8 = por %p385_p4, %p384_p5 }
  0x22   : > { %p380_p0 = pneg %p379_p6 }
  0x24   : > { %p387_p12 = pnand %p386_p8, %p380_p0 }
  0x26   : > { %390 = shalt.err (!%p387_p12)
}
  0x27   : > { %317 = dma.hbm_to_vmem [thread:$0]  (!%p565_p11), %s723_s1, 768, %s555_s19, [#allocation6]  }
  0x28   : > { %p733_p1 = scmp.ne.s32.totalorder %s732_s23, 0  ;;  %p34_p2 = scmp.eq.s32.totalorder %s491_s12, 0 }
  0x29   : > { %p734_p4 = scmp.ne.s32.totalorder %s487_s11, %s483_s10  ;;  %p735_p6 = scmp.eq.s32.totalorder %s532_s13, 1 }
  0x2a   : > { %s605_s18 = scalar_select %p733_p1, %s487_s11, %s26_s24  }
  0x2b   : > { %p613_p8 = por %p735_p6, %p734_p4  ;;  %p327_p9 = scmp.lt.s32.totalorder %s491_s12, 2 }
  0x2c   : > { %s121_s22 = sand.u32 1, %s487_s11   ;;  %p737_p12 = pmov %p734_p4 }
  0x2d   : > { %s302_s25 = smul.u32 48, %s121_s22  ;;  %s122_s30 = scalar_lea.sflag [#allocation3], %s121_s22 }
  0x2e   : > { %p35_p13 = por %p34_p2, %p737_p12  ;;  %s303_s26 = smul.u32 768, %s491_s12 }
  0x2f   : > { %s125_s28 = scalar_lea.vmem [#allocation2], %s302_s25  ;;  %s396_s6 = scalar_lea.hbm %s722_s0, 1536 }
  0x30   : > { %p623_p3 = pnand %p327_p9, %p35_p13  ;;  %s630_s24 = scalar_lea.hbm %s722_s0, %s303_s26 }
  0x31   : > { %s133_s29 = sshll.u32 %s125_s28, 4  ;;  %s391_s3 = scalar_lea.hbm %s630_s24, 768  ;;  %s632_s29 = int_to_ptr.vmem [resolvable:$true] %s133_s29 }
  0x32   : > { %p392_p11 = scmp.ne.s32.totalorder %s630_s24, %s391_s3  ;;  %p393_p7 = pneg %p623_p3 }
  0x33   : > { %p397_p5 = scmp.lt.u32.totalorder %s630_s24, %s722_s0  ;;  %p398_p1 = scmp.lt.u32.totalorder %s396_s6, %s391_s3 }
  0x34   : > { %p394_p10 = pnand %p393_p7, %p392_p11  ;;  %p400_p4 = scmp.lt.u32.totalorder %s391_s3, %s630_s24 }
  0x35   : > { %p399_p2 = por %p398_p1, %p397_p5 }
  0x36   : > { %p395_p0 = pneg %p394_p10 }
  0x37   : > { %p401_p6 = por %p400_p4, %p399_p2 }
  0x39   : > { %p402_p9 = pnand %p401_p6, %p395_p0 }
  0x3b   : > { %405 = shalt.err (!%p402_p9)
}
  0x3c   : > { %s406_s14 = scalar_lea.vmem %s632_s29, 768  ;;  %s494_s22 = smov [#allocation2]  }
  0x3d   : > { %p407_p12 = scmp.ne.s32.totalorder %s632_s29, %s406_s14  ;;  %s411_s25 = sshll.u32 %s494_s22, 4  ;;  %s412_s25 = int_to_ptr.vmem [resolvable:$false] %s411_s25 }
  0x3e   : > { %s413_s26 = scalar_lea.vmem %s412_s25, 1536  ;;  %p414_p10 = scmp.lt.s32.totalorder %s632_s29, %s412_s25 }
  0x3f   : > { %p409_p13 = pnand %p407_p12, %p393_p7  ;;  %p415_p5 = scmp.lt.s32.totalorder %s413_s26, %s406_s14 }
  0x41   : > { %p410_p11 = pneg %p409_p13  ;;  %p416_p1 = por %p415_p5, %p414_p10 }
  0x43   : > { %p417_p2 = pnand %p416_p1, %p410_p11 }
  0x45   : > { %420 = shalt.err (!%p417_p2)
}
  0x46   : > { %321 = dma.hbm_to_vmem [thread:$0]  (!%p623_p3), %s630_s24, 768, %s632_s29, %s122_s30  }
  0x47   : > { %p739_p0 = scmp.ne.s32.totalorder %s730_s17, 0 }
  0x48   : > { %s662_s19 = sand.u32 (!%p739_p0), 1, %s483_s10   ;;  %p740_p7 = scmp.ne.s32.totalorder (!%p739_p0), %s728_s15, 0 }
  0x49   : > { %142 = sbr.rel (%p739_p0) target bundleno = 109 (0x6d), region = 28  ;;  %s145_s28 = scalar_lea.sflag (!%p739_p0), [#allocation3], %s662_s19 }
  0x4a   : > { %s304_s23 = smul.u32 (!%p739_p0), 48, %s662_s19 }
  0x4c   : > { %s148_s3 = scalar_lea.vmem (!%p739_p0), [#allocation2], %s304_s23 }
  0x50   : > { %466 = dma.done.wait (%p740_p7), %s145_s28, 768  }
  0x51   : > { %468 = vsyncadd (%p740_p7), %s145_s28, 4294966528  ;;  %p741_p4 = scmp.eq.s32.totalorder %s532_s13, 0 }
  0x53   : > { %470 = dma.done.wait (%p741_p4), [#allocation6], 768   ;;  %p742_p3 = pmov %p741_p4 }
  0x54   : > { %v173_v0 = vld [vmem:[%s148_s3] sm:$0xff]  ;;  %v174_v2 = vld [vmem:[%s148_s3 + $0x8] sm:$0xff]  ;;  %s305_s17 = smul.u32 768, %s532_s13  ;;  %s172_s27 = scalar_lea.vmem [#allocation7], %s304_s23  ;;  %v175_v5 = vld [vmem:[%s148_s3 + $0x10] sm:$0xff] }
  0x55   : > { %472 = vsyncadd (%p742_p3), [#allocation6], 4294966528  ;;  %v179_v1 = vld [vmem:[#allocation5] sm:$0xff]  ;;  %s212_s24 = sshll.u32 %s172_s27, 4  ;;  %v180_v4 = vld [vmem:[#allocation5 + $0x8] sm:$0xff]  ;;  %s198_s30 = scalar_lea.sflag [#allocation4], %s662_s19  ;;  %s675_s24 = int_to_ptr.vmem [resolvable:$true] %s212_s24 }
  0x56   : > { %v185_v3 = vadd.f32 %v179_v1, %v173_v0  ;;  %v181_v6 = vld [vmem:[#allocation5 + $0x10] sm:$0xff]  ;;  %v186_v7 = vadd.f32 %v180_v4, %v174_v2  ;;  %v176_v9 = vld [vmem:[%s148_s3 + $0x18] sm:$0xff]  ;;  %v183_v13 = vld [vmem:[#allocation5 + $0x20] sm:$0xff]  ;;  %s680_s29 = scalar_lea.hbm %s724_s2, %s305_s17  ;;  %s421_s4 = scalar_lea.vmem %s675_s24, 768 }
  0x57   : > { %v187_v8 = vadd.f32 %v181_v6, %v175_v5  ;;  %v182_v10 = vld [vmem:[#allocation5 + $0x18] sm:$0xff]  ;;  %v177_v11 = vld [vmem:[%s148_s3 + $0x20] sm:$0xff]  ;;  %v184_v15 = vld [vmem:[#allocation5 + $0x28] sm:$0xff]  ;;  %p422_p6 = scmp.ne.s32.totalorder %s675_s24, %s421_s4  ;;  %s495_s5 = smov [#allocation7]  }
  0x58   : > { %191 = vst [vmem:[%s172_s27] sm:$0xff] %v185_v3  ;;  %v188_v12 = vadd.f32 %v182_v10, %v176_v9  ;;  %v178_v14 = vld [vmem:[%s148_s3 + $0x28] sm:$0xff]  ;;  %192 = vst [vmem:[%s172_s27 + $0x8] sm:$0xff] %v186_v7  ;;  %v189_v16 = vadd.f32 %v183_v13, %v177_v11  ;;  %s425_s6 = sshll.u32 %s495_s5, 4  ;;  %s426_s6 = int_to_ptr.vmem [resolvable:$false] %s425_s6 }
  0x59   : > { %193 = vst [vmem:[%s172_s27 + $0x10] sm:$0xff] %v187_v8  ;;  %v190_v17 = vadd.f32 %v184_v15, %v178_v14  ;;  %p423_p9 = pnand %p422_p6, %p613_p8  ;;  %s427_s7 = scalar_lea.vmem %s426_s6, 1536 }
  0x5a   : > { %194 = vst [vmem:[%s172_s27 + $0x18] sm:$0xff] %v188_v12  ;;  %195 = vst [vmem:[%s172_s27 + $0x20] sm:$0xff] %v189_v16  ;;  %p428_p13 = scmp.lt.s32.totalorder %s675_s24, %s426_s6  ;;  %p429_p11 = scmp.lt.s32.totalorder %s427_s7, %s421_s4 }
  0x5b   : > { %196 = vst [vmem:[%s172_s27 + $0x28] sm:$0xff] %v190_v17  ;;  %p424_p12 = pneg %p423_p9 }
  0x5c   : > { %p430_p10 = por %p429_p11, %p428_p13 }
  0x5e   : > { %p431_p5 = pnand %p430_p10, %p424_p12 }
  0x60   : > { %434 = shalt.err (!%p431_p5)
}
  0x61   : > { %s435_s8 = scalar_lea.hbm %s680_s29, 768  ;;  %s439_s25 = scalar_lea.hbm %s724_s2, 1536 }
  0x62   : > { %p436_p1 = scmp.ne.s32.totalorder %s680_s29, %s435_s8  ;;  %p440_p7 = scmp.lt.u32.totalorder %s680_s29, %s724_s2 }
  0x63   : > { %p441_p4 = scmp.lt.u32.totalorder %s439_s25, %s435_s8  ;;  %p443_p6 = scmp.lt.u32.totalorder %s435_s8, %s680_s29 }
  0x64   : > { %p437_p2 = pnand %p436_p1, %p613_p8 }
  0x65   : > { %p442_p3 = por %p441_p4, %p440_p7 }
  0x66   : > { %p438_p0 = pneg %p437_p2 }
  0x67   : > { %p444_p9 = por %p443_p6, %p442_p3 }
  0x69   : > { %p445_p12 = pnand %p444_p9, %p438_p0 }
  0x6b   : > { %448 = shalt.err (!%p445_p12)
}
  0x6c   : > { %312 = dma.vmem_to_hbm [thread:$0]  (%p613_p8), %s675_s24, 768, %s680_s29, %s198_s30  }
  0x6d PF: > { %s224_s23 = sand.u32 1, %s479_s9   ;;  %p743_p13 = scmp.ne.s32.totalorder %s729_s16, 0 }
  0x6e   : > { %p744_p11 = scmp.ge.s32.totalorder %s491_s12, 2  ;;  %s225_s28 = scalar_lea.sflag [#allocation4], %s224_s23 }
  0x70   : > { %p323_p10 = pnand %p744_p11, %p743_p13 }
  0x72   : > { %474 = dma.done.wait (!%p323_p10), %s225_s28, 768  }
  0x73   : > { %476 = vsyncadd (!%p323_p10), %s225_s28, 4294966528  ;;  %p16_p5 = scmp.ge.s32.totalorder %s561_s20, 4   ;;  %s745_s9 = smov %s483_s10 }
  0x74   : > { %s746_s10 = smov %s487_s11  ;;  %s747_s11 = smov %s605_s18 }
  0x75   : > { %s748_s12 = smov %s561_s20  ;;  %18 = sbr.rel (!%p16_p5) target bundleno = 6 (0x6), region = 77 }
  0x7c   :  { %230 = vsyncpa [#allocation3], 1 }
  0x7d   :  { %232 = vsyncpa [#allocation3 + $0x1], 1 }
  0x7e   :  { %233 = vsyncpa [#allocation6], 1 }
  0x7f   :  { %234 = vsyncpa [#allocation4], 1 }
  0x80   :  { %236 = vsyncpa [#allocation4 + $0x1], 1 }

// kernel: tpu_custom_call.1
= control target key start
LH: loop header
LB: loop body
LE: loop exit
PB: predicated region body
PF: predicated region fallthrough
CT: control target
= control target key end

     0   :  { %7 = vsyncpa [#allocation3], 0  ;;  %s722_s0 = inlined_call_operand.hbm [shape: f32[2,8,768], index: 0, kind: input, shape index: {}]   ;;  %s723_s1 = inlined_call_operand.hbm [shape: f32[512,768], index: 1, kind: input, shape index: {}]   ;;  %s724_s2 = inlined_call_operand.hbm [shape: f32[2,8,768], index: 2, kind: output, shape index: {}]  }
   0x1   :  { %9 = vsyncpa [#allocation3 + $0x1], 0 }
   0x2   :  { %10 = vsyncpa [#allocation6], 0 }
   0x3   :  { %11 = vsyncpa [#allocation4], 0 }
   0x4   :  { %13 = vsyncpa [#allocation4 + $0x1], 0  ;;  %s511_s9 = smov 0   ;;  %s513_s10 = smov 0  }
   0x5   :  { %s515_s11 = smov 0   ;;  %s517_s12 = smov 0  }
   0x6 LB: > { %s532_s13 = sadd.s32 4294967295, %s491_s12   ;;  %s292_s14 = sadd.s32 4294967294, %s491_s12   ;;  %s491_s12 = sphi %s517_s12, %s748_s12   ;;  %s487_s11 = sphi %s515_s11, %s747_s11   ;;  %s483_s10 = sphi %s513_s10, %s746_s10   ;;  %s479_s9 = sphi %s511_s9, %s745_s9  }
   0x7   : > { %p39_p0 = scmp.ne.s32.totalorder %s483_s10, %s479_s9  ;;  %p725_p1 = scmp.eq.s32.totalorder %s532_s13, 0 }
   0x8   : > { %p90_p3 = scmp.eq.s32.totalorder %s292_s14, 1  ;;  %p293_p5 = scmp.ge.s32.totalorder %s491_s12, 1 }
   0x9   : > { %p541_p4 = por %p725_p1, %p39_p0  ;;  %p97_p7 = scmp.lt.s32.totalorder %s491_s12, 3 }
   0xa   : > { %p546_p6 = por %p90_p3, %p39_p0  ;;  %s493_s18 = smov [#allocation5]  }
   0xb   : > { %s728_s15 = scalar_select %p541_p4, 1, 0 }
   0xc   : > { %s729_s16 = scalar_select %p546_p6, 1, 0 }
   0xd   : > { %p551_p8 = pnand %p293_p5, %p97_p7  ;;  %s110_s19 = sshll.u32 %s493_s18, 4  ;;  %s555_s19 = int_to_ptr.vmem [resolvable:$true] %s110_s19 }
   0xe   : > { %s561_s20 = sadd.s32 1, %s491_s12   ;;  %s26_s24 = sadd.s32 1, %s487_s11 }
   0xf   : > { %s730_s17 = scalar_select %p551_p8, 1, 0 }
  0x10   : > { %p314_p10 = pneg %p551_p8  ;;  %s23_s22 = ssub.s32 %s491_s12, %s561_s20 }
  0x11   : > { %p571_p12 = scmp.eq.s32.totalorder %s23_s22, 0  ;;  %s363_s27 = scalar_lea.hbm %s723_s1, 768 }
  0x12   : > { %p565_p11 = pnand %p314_p10, %p725_p1  ;;  %p364_p0 = scmp.ne.s32.totalorder %s723_s1, %s363_s27 }
  0x13   : > { %s732_s23 = scalar_select %p571_p12, 1, 0 }
  0x14   : > { %p365_p3 = pneg %p565_p11  ;;  %s368_s4 = scalar_lea.hbm %s723_s1, 49152 }
  0x15   : > { %p369_p10 = scmp.lt.u32.totalorder %s368_s4, %s363_s27  ;;  %p370_p9 = scmp.lt.u32.totalorder %s363_s27, %s723_s1 }
  0x16   : > { %p366_p5 = pnand %p365_p3, %p364_p0 }
  0x17   : > { %p371_p1 = por %p370_p9, %p369_p10 }
  0x18   : > { %p367_p7 = pneg %p366_p5 }
  0x1a   : > { %p372_p2 = pnand %p371_p1, %p367_p7 }
  0x1c   : > { %375 = shalt.err (!%p372_p2)
}
  0x1d   : > { %s376_s7 = scalar_lea.vmem %s555_s19, 768  ;;  %p384_p5 = scmp.lt.s32.totalorder %s555_s19, %s555_s19 }
  0x1e   : > { %p377_p13 = scmp.ne.s32.totalorder %s555_s19, %s376_s7  ;;  %p385_p4 = scmp.lt.s32.totalorder %s376_s7, %s376_s7 }
  0x20   : > { %p379_p6 = pnand %p377_p13, %p365_p3  ;;  %p386_p8 = por %p385_p4, %p384_p5 }
  0x22   : > { %p380_p0 = pneg %p379_p6 }
  0x24   : > { %p387_p12 = pnand %p386_p8, %p380_p0 }
  0x26   : > { %390 = shalt.err (!%p387_p12)
}
  0x27   : > { %317 = dma.hbm_to_vmem [thread:$0]  (!%p565_p11), %s723_s1, 768, %s555_s19, [#allocation6]  }
  0x28   : > { %p733_p1 = scmp.ne.s32.totalorder %s732_s23, 0  ;;  %p34_p2 = scmp.eq.s32.totalorder %s491_s12, 0 }
  0x29   : > { %p734_p4 = scmp.ne.s32.totalorder %s487_s11, %s483_s10  ;;  %p735_p6 = scmp.eq.s32.totalorder %s532_s13, 1 }
  0x2a   : > { %s605_s18 = scalar_select %p733_p1, %s487_s11, %s26_s24  }
  0x2b   : > { %p613_p8 = por %p735_p6, %p734_p4  ;;  %p327_p9 = scmp.lt.s32.totalorder %s491_s12, 2 }
  0x2c   : > { %s121_s22 = sand.u32 1, %s487_s11   ;;  %p737_p12 = pmov %p734_p4 }
  0x2d   : > { %s302_s25 = smul.u32 48, %s121_s22  ;;  %s122_s30 = scalar_lea.sflag [#allocation3], %s121_s22 }
  0x2e   : > { %p35_p13 = por %p34_p2, %p737_p12  ;;  %s303_s26 = smul.u32 768, %s491_s12 }
  0x2f   : > { %s125_s28 = scalar_lea.vmem [#allocation2], %s302_s25  ;;  %s396_s6 = scalar_lea.hbm %s722_s0, 1536 }
  0x30   : > { %p623_p3 = pnand %p327_p9, %p35_p13  ;;  %s630_s24 = scalar_lea.hbm %s722_s0, %s303_s26 }
  0x31   : > { %s133_s29 = sshll.u32 %s125_s28, 4  ;;  %s391_s3 = scalar_lea.hbm %s630_s24, 768  ;;  %s632_s29 = int_to_ptr.vmem [resolvable:$true] %s133_s29 }
  0x32   : > { %p392_p11 = scmp.ne.s32.totalorder %s630_s24, %s391_s3  ;;  %p393_p7 = pneg %p623_p3 }
  0x33   : > { %p397_p5 = scmp.lt.u32.totalorder %s630_s24, %s722_s0  ;;  %p398_p1 = scmp.lt.u32.totalorder %s396_s6, %s391_s3 }
  0x34   : > { %p394_p10 = pnand %p393_p7, %p392_p11  ;;  %p400_p4 = scmp.lt.u32.totalorder %s391_s3, %s630_s24 }
  0x35   : > { %p399_p2 = por %p398_p1, %p397_p5 }
  0x36   : > { %p395_p0 = pneg %p394_p10 }
  0x37   : > { %p401_p6 = por %p400_p4, %p399_p2 }
  0x39   : > { %p402_p9 = pnand %p401_p6, %p395_p0 }
  0x3b   : > { %405 = shalt.err (!%p402_p9)
}
  0x3c   : > { %s406_s14 = scalar_lea.vmem %s632_s29, 768  ;;  %s494_s22 = smov [#allocation2]  }
  0x3d   : > { %p407_p12 = scmp.ne.s32.totalorder %s632_s29, %s406_s14  ;;  %s411_s25 = sshll.u32 %s494_s22, 4  ;;  %s412_s25 = int_to_ptr.vmem [resolvable:$false] %s411_s25 }
  0x3e   : > { %s413_s26 = scalar_lea.vmem %s412_s25, 1536  ;;  %p414_p10 = scmp.lt.s32.totalorder %s632_s29, %s412_s25 }
  0x3f   : > { %p409_p13 = pnand %p407_p12, %p393_p7  ;;  %p415_p5 = scmp.lt.s32.totalorder %s413_s26, %s406_s14 }
  0x41   : > { %p410_p11 = pneg %p409_p13  ;;  %p416_p1 = por %p415_p5, %p414_p10 }
  0x43   : > { %p417_p2 = pnand %p416_p1, %p410_p11 }
  0x45   : > { %420 = shalt.err (!%p417_p2)
}
  0x46   : > { %321 = dma.hbm_to_vmem [thread:$0]  (!%p623_p3), %s630_s24, 768, %s632_s29, %s122_s30  }
  0x47   : > { %p739_p0 = scmp.ne.s32.totalorder %s730_s17, 0 }
  0x48   : > { %s662_s19 = sand.u32 (!%p739_p0), 1, %s483_s10   ;;  %p740_p7 = scmp.ne.s32.totalorder (!%p739_p0), %s728_s15, 0 }
  0x49   : > { %142 = sbr.rel (%p739_p0) target bundleno = 109 (0x6d), region = 28  ;;  %s145_s28 = scalar_lea.sflag (!%p739_p0), [#allocation3], %s662_s19 }
  0x4a   : > { %s304_s23 = smul.u32 (!%p739_p0), 48, %s662_s19 }
  0x4c   : > { %s148_s3 = scalar_lea.vmem (!%p739_p0), [#allocation2], %s304_s23 }
  0x50   : > { %466 = dma.done.wait (%p740_p7), %s145_s28, 768  }
  0x51   : > { %468 = vsyncadd (%p740_p7), %s145_s28, 4294966528  ;;  %p741_p4 = scmp.eq.s32.totalorder %s532_s13, 0 }
  0x53   : > { %470 = dma.done.wait (%p741_p4), [#allocation6], 768   ;;  %p742_p3 = pmov %p741_p4 }
  0x54   : > { %v173_v0 = vld [vmem:[%s148_s3] sm:$0xff]  ;;  %v174_v2 = vld [vmem:[%s148_s3 + $0x8] sm:$0xff]  ;;  %s305_s17 = smul.u32 768, %s532_s13  ;;  %s172_s27 = scalar_lea.vmem [#allocation7], %s304_s23  ;;  %v175_v5 = vld [vmem:[%s148_s3 + $0x10] sm:$0xff] }
  0x55   : > { %472 = vsyncadd (%p742_p3), [#allocation6], 4294966528  ;;  %v179_v1 = vld [vmem:[#allocation5] sm:$0xff]  ;;  %s212_s24 = sshll.u32 %s172_s27, 4  ;;  %v180_v4 = vld [vmem:[#allocation5 + $0x8] sm:$0xff]  ;;  %s198_s30 = scalar_lea.sflag [#allocation4], %s662_s19  ;;  %s675_s24 = int_to_ptr.vmem [resolvable:$true] %s212_s24 }
  0x56   : > { %v185_v3 = vadd.f32 %v179_v1, %v173_v0  ;;  %v181_v6 = vld [vmem:[#allocation5 + $0x10] sm:$0xff]  ;;  %v186_v7 = vadd.f32 %v180_v4, %v174_v2  ;;  %v176_v9 = vld [vmem:[%s148_s3 + $0x18] sm:$0xff]  ;;  %v183_v13 = vld [vmem:[#allocation5 + $0x20] sm:$0xff]  ;;  %s680_s29 = scalar_lea.hbm %s724_s2, %s305_s17  ;;  %s421_s4 = scalar_lea.vmem %s675_s24, 768 }
  0x57   : > { %v187_v8 = vadd.f32 %v181_v6, %v175_v5  ;;  %v182_v10 = vld [vmem:[#allocation5 + $0x18] sm:$0xff]  ;;  %v177_v11 = vld [vmem:[%s148_s3 + $0x20] sm:$0xff]  ;;  %v184_v15 = vld [vmem:[#allocation5 + $0x28] sm:$0xff]  ;;  %p422_p6 = scmp.ne.s32.totalorder %s675_s24, %s421_s4  ;;  %s495_s5 = smov [#allocation7]  }
  0x58   : > { %191 = vst [vmem:[%s172_s27] sm:$0xff] %v185_v3  ;;  %v188_v12 = vadd.f32 %v182_v10, %v176_v9  ;;  %v178_v14 = vld [vmem:[%s148_s3 + $0x28] sm:$0xff]  ;;  %192 = vst [vmem:[%s172_s27 + $0x8] sm:$0xff] %v186_v7  ;;  %v189_v16 = vadd.f32 %v183_v13, %v177_v11  ;;  %s425_s6 = sshll.u32 %s495_s5, 4  ;;  %s426_s6 = int_to_ptr.vmem [resolvable:$false] %s425_s6 }
  0x59   : > { %193 = vst [vmem:[%s172_s27 + $0x10] sm:$0xff] %v187_v8  ;;  %v190_v17 = vadd.f32 %v184_v15, %v178_v14  ;;  %p423_p9 = pnand %p422_p6, %p613_p8  ;;  %s427_s7 = scalar_lea.vmem %s426_s6, 1536 }
  0x5a   : > { %194 = vst [vmem:[%s172_s27 + $0x18] sm:$0xff] %v188_v12  ;;  %195 = vst [vmem:[%s172_s27 + $0x20] sm:$0xff] %v189_v16  ;;  %p428_p13 = scmp.lt.s32.totalorder %s675_s24, %s426_s6  ;;  %p429_p11 = scmp.lt.s32.totalorder %s427_s7, %s421_s4 }
  0x5b   : > { %196 = vst [vmem:[%s172_s27 + $0x28] sm:$0xff] %v190_v17  ;;  %p424_p12 = pneg %p423_p9 }
  0x5c   : > { %p430_p10 = por %p429_p11, %p428_p13 }
  0x5e   : > { %p431_p5 = pnand %p430_p10, %p424_p12 }
  0x60   : > { %434 = shalt.err (!%p431_p5)
}
  0x61   : > { %s435_s8 = scalar_lea.hbm %s680_s29, 768  ;;  %s439_s25 = scalar_lea.hbm %s724_s2, 1536 }
  0x62   : > { %p436_p1 = scmp.ne.s32.totalorder %s680_s29, %s435_s8  ;;  %p440_p7 = scmp.lt.u32.totalorder %s680_s29, %s724_s2 }
  0x63   : > { %p441_p4 = scmp.lt.u32.totalorder %s439_s25, %s435_s8  ;;  %p443_p6 = scmp.lt.u32.totalorder %s435_s8, %s680_s29 }
  0x64   : > { %p437_p2 = pnand %p436_p1, %p613_p8 }
  0x65   : > { %p442_p3 = por %p441_p4, %p440_p7 }
  0x66   : > { %p438_p0 = pneg %p437_p2 }
  0x67   : > { %p444_p9 = por %p443_p6, %p442_p3 }
  0x69   : > { %p445_p12 = pnand %p444_p9, %p438_p0 }
  0x6b   : > { %448 = shalt.err (!%p445_p12)
}
  0x6c   : > { %312 = dma.vmem_to_hbm [thread:$0]  (%p613_p8), %s675_s24, 768, %s680_s29, %s198_s30  }
  0x6d PF: > { %s224_s23 = sand.u32 1, %s479_s9   ;;  %p743_p13 = scmp.ne.s32.totalorder %s729_s16, 0 }
  0x6e   : > { %p744_p11 = scmp.ge.s32.totalorder %s491_s12, 2  ;;  %s225_s28 = scalar_lea.sflag [#allocation4], %s224_s23 }
  0x70   : > { %p323_p10 = pnand %p744_p11, %p743_p13 }
  0x72   : > { %474 = dma.done.wait (!%p323_p10), %s225_s28, 768  }
  0x73   : > { %476 = vsyncadd (!%p323_p10), %s225_s28, 4294966528  ;;  %p16_p5 = scmp.ge.s32.totalorder %s561_s20, 4   ;;  %s745_s9 = smov %s483_s10 }
  0x74   : > { %s746_s10 = smov %s487_s11  ;;  %s747_s11 = smov %s605_s18 }
  0x75   : > { %s748_s12 = smov %s561_s20  ;;  %18 = sbr.rel (!%p16_p5) target bundleno = 6 (0x6), region = 77 }
  0x7c   :  { %230 = vsyncpa [#allocation3], 1 }
  0x7d   :  { %232 = vsyncpa [#allocation3 + $0x1], 1 }
  0x7e   :  { %233 = vsyncpa [#allocation6], 1 }
  0x7f   :  { %234 = vsyncpa [#allocation4], 1 }
  0x80   :  { %236 = vsyncpa [#allocation4 + $0x1], 1 }

</bundles_post_ra>
